<compile_context>
chip_gen: v5e
topology: v5e:2x2
jax: 0.10.0
libtpu: 0.0.40
codegen_flags: <defaults>
</compile_context>

<pallas_src>
import math
import functools

import jax
import jax.numpy as jnp
from jax.experimental import pallas as pl
from jax.experimental.pallas import tpu as pltpu


# ----------------------------------------------------------------------------
# Shared math helpers (used both inside the kernel and by the pure-JAX ref).
# ----------------------------------------------------------------------------
def _layer_norm(x, g, b, eps):
    mu = jnp.mean(x, axis=-1, keepdims=True)
    var = jnp.mean(jnp.square(x - mu), axis=-1, keepdims=True)
    return (x - mu) * jax.lax.rsqrt(var + eps) * g + b


def _gelu_tanh(x):
    # TODO(synk): exact erf-GELU (HF default "gelu") once lax.erf lowering is
    # confirmed for Mosaic; tanh approximation ("gelu_new") differs by <~1e-3.
    c = math.sqrt(2.0 / math.pi)
    return 0.5 * x * (1.0 + jnp.tanh(c * (x + 0.044715 * x * x * x)))


# ----------------------------------------------------------------------------
# Fused PerceiverLayer kernel: one grid step == one batch element, full [S, D].
# ----------------------------------------------------------------------------
def _perceiver_layer_kernel(
    x_ref,
    ln1_g_ref, ln1_b_ref,
    wq_ref, bq_ref,
    wk_ref, bk_ref,
    wv_ref, bv_ref,
    wo_ref, bo_ref,
    ln2_g_ref, ln2_b_ref,
    w1_ref, b1_ref,
    w2_ref, b2_ref,
    out_ref,
    *, num_heads, eps):
    f32 = jnp.float32
    x = x_ref[...].astype(f32)                                   # [S, D]

    # ---- LayerNorm1 ---------------------------------------------------------
    xn = _layer_norm(x, ln1_g_ref[...].astype(f32), ln1_b_ref[...].astype(f32), eps)

    # ---- Q / K / V projections (MXU, f32 accumulate) ------------------------
    q = jnp.dot(xn, wq_ref[...], preferred_element_type=f32) + bq_ref[...].astype(f32)
    k = jnp.dot(xn, wk_ref[...], preferred_element_type=f32) + bk_ref[...].astype(f32)
    v = jnp.dot(xn, wv_ref[...], preferred_element_type=f32) + bv_ref[...].astype(f32)

    dqk = q.shape[-1] // num_heads
    dv = v.shape[-1] // num_heads
    scale = 1.0 / math.sqrt(dqk)

    # ---- multi-head attention (heads unrolled at trace time) ----------------
    ctx_parts = []
    for h in range(num_heads):
        qh = q[:, h * dqk:(h + 1) * dqk]                          # [S, dqk]
        kh = k[:, h * dqk:(h + 1) * dqk]                          # [S, dqk]
        vh = v[:, h * dv:(h + 1) * dv]                            # [S, dv]
        # scores = qh @ kh^T without materializing a transpose.
        s = jax.lax.dot_general(qh, kh, (((1,), (1,)), ((), ())),
                                preferred_element_type=f32) * scale
        s = s - jnp.max(s, axis=-1, keepdims=True)
        e = jnp.exp(s)
        probs = e / jnp.sum(e, axis=-1, keepdims=True)
        # TODO(synk): attention-prob dropout omitted (eval-mode identity).
        ctx_parts.append(jnp.dot(probs, vh, preferred_element_type=f32))
    ctx = ctx_parts[0] if num_heads == 1 else jnp.concatenate(ctx_parts, axis=-1)

    # ---- SelfOutput dense + query residual -----------------------------------
    attn_out = (jnp.dot(ctx, wo_ref[...], preferred_element_type=f32)
                + bo_ref[...].astype(f32) + x)                    # [S, D]

    # ---- LayerNorm2 + MLP + residual -----------------------------------------
    yn = _layer_norm(attn_out, ln2_g_ref[...].astype(f32),
                     ln2_b_ref[...].astype(f32), eps)
    h1 = jnp.dot(yn, w1_ref[...], preferred_element_type=f32) + b1_ref[...].astype(f32)
    h1 = _gelu_tanh(h1)
    h2 = jnp.dot(h1, w2_ref[...], preferred_element_type=f32) + b2_ref[...].astype(f32)

    out_ref[...] = (h2 + attn_out).astype(out_ref.dtype)


# ----------------------------------------------------------------------------
# Wrapper
# ----------------------------------------------------------------------------
def perceiver_layer(hidden_states, params, *, num_heads=1, eps=1e-5):
    """hidden_states: [B, S, D]; params: dict of PyTorch-layout weights/biases.

    Weight layouts (PyTorch nn.Linear): w* is [out, in], b* is [out].
    LayerNorm params ln*_g / ln*_b are [D].
    """
    B, S, D = hidden_states.shape
    wq, bq = params["wq"], params["bq"]
    wk, bk = params["wk"], params["bk"]
    wv, bv = params["wv"], params["bv"]
    wo, bo = params["wo"], params["bo"]
    w1, b1 = params["w1"], params["b1"]
    w2, b2 = params["w2"], params["b2"]
    ln1_g, ln1_b = params["ln1_g"], params["ln1_b"]
    ln2_g, ln2_b = params["ln2_g"], params["ln2_b"]

    Dqk = wq.shape[0]
    Dv = wv.shape[0]
    Dh = w1.shape[0]
    assert Dqk % num_heads == 0 and Dv % num_heads == 0

    # Pre-transpose to (in, out) so the hot path is a plain MXU matmul.
    # NOTE: for repeated inference calls, hoist these transposes out of the
    # loop (store the weights pre-transposed) to avoid per-call HBM copies.
    wq_t, wk_t, wv_t = wq.T, wk.T, wv.T
    wo_t, w1_t, w2_t = wo.T, w1.T, w2.T

    # 2-D views so bias / LN params broadcast lane-wise inside the kernel.
    bq2, bk2, bv2, bo2 = (bq.reshape(1, -1), bk.reshape(1, -1),
                          bv.reshape(1, -1), bo.reshape(1, -1))
    b12, b22 = b1.reshape(1, -1), b2.reshape(1, -1)
    ln1_g2, ln1_b2 = ln1_g.reshape(1, -1), ln1_b.reshape(1, -1)
    ln2_g2, ln2_b2 = ln2_g.reshape(1, -1), ln2_b.reshape(1, -1)

    def rep_spec(shape):
        # Constant-index full-array block (weights / biases stay VMEM-resident).
        return pl.BlockSpec(shape, lambda b, _n=len(shape): (0,) * _n)

    x_spec = pl.BlockSpec((None, S, D), lambda b: (b, 0, 0))
    out_spec = pl.BlockSpec((None, S, D), lambda b: (b, 0, 0))

    in_specs = [
        x_spec,
        rep_spec((1, D)), rep_spec((1, D)),            # ln1 gamma / beta
        rep_spec((D, Dqk)), rep_spec((1, Dqk)),        # Wq^T, bq
        rep_spec((D, Dqk)), rep_spec((1, Dqk)),        # Wk^T, bk
        rep_spec((D, Dv)), rep_spec((1, Dv)),          # Wv^T, bv
        rep_spec((Dv, D)), rep_spec((1, D)),           # Wo^T, bo
        rep_spec((1, D)), rep_spec((1, D)),            # ln2 gamma / beta
        rep_spec((D, Dh)), rep_spec((1, Dh)),          # W1^T, b1
        rep_spec((Dh, D)), rep_spec((1, D)),           # W2^T, b2
    ]

    # VMEM budget: x/out tiles (double-buffered) + resident weights + a rough
    # allowance for in-kernel intermediates; capped at 64 MiB so it also fits
    # v7x physical VMEM.
    f32b = 4
    block_bytes = (
        2 * 2 * S * D * f32b
        + 2 * (2 * D * Dqk + D * Dv + Dv * D + D * Dh + Dh * D) * f32b
        + 2 * (2 * Dqk + Dv + 6 * D + Dh) * f32b
    )
    work_bytes = S * (2 * Dqk + Dv + S + Dh + 4 * D) * f32b
    vmem_limit = int(min(64 * 2 ** 20,
                         max(32 * 2 ** 20, 2 * (block_bytes + work_bytes))))

    kernel = functools.partial(_perceiver_layer_kernel,
                               num_heads=num_heads, eps=eps)

    out = pl.pallas_call(
        kernel,
        out_shape=jax.ShapeDtypeStruct((B, S, D), hidden_states.dtype),
        grid_spec=pltpu.PrefetchScalarGridSpec(
            num_scalar_prefetch=0,
            grid=(B,),
            in_specs=in_specs,
            out_specs=out_spec,
        ),
        compiler_params=pltpu.CompilerParams(
            dimension_semantics=("parallel",),
            vmem_limit_bytes=vmem_limit,
        ),
    )(hidden_states,
      ln1_g2, ln1_b2,
      wq_t, bq2, wk_t, bk2, wv_t, bv2,
      wo_t, bo2,
      ln2_g2, ln2_b2,
      w1_t, b12, w2_t, b22)

    return out


# ----------------------------------------------------------------------------
# Pure-JAX reference (same math, HIGHEST matmul precision) for the check.
# ----------------------------------------------------------------------------
def perceiver_layer_reference(x, p, *, num_heads=1, eps=1e-5):
    hp = jax.lax.Precision.HIGHEST
    mm = lambda a, b: jnp.matmul(a, b, precision=hp)
    x = x.astype(jnp.float32)
    xn = _layer_norm(x, p["ln1_g"], p["ln1_b"], eps)
    q = mm(xn, p["wq"].T) + p["bq"]
    k = mm(xn, p["wk"].T) + p["bk"]
    v = mm(xn, p["wv"].T) + p["bv"]
    B, S, _ = x.shape
    dqk = q.shape[-1] // num_heads
    dv = v.shape[-1] // num_heads
    qh = q.reshape(B, S, num_heads, dqk).transpose(0, 2, 1, 3)
    kh = k.reshape(B, S, num_heads, dqk).transpose(0, 2, 1, 3)
    vh = v.reshape(B, S, num_heads, dv).transpose(0, 2, 1, 3)
    s = jnp.einsum("bhqd,bhkd->bhqk", qh, kh, precision=hp) / math.sqrt(dqk)
    probs = jax.nn.softmax(s, axis=-1)
    ctx = jnp.einsum("bhqk,bhkd->bhqd", probs, vh, precision=hp)
    ctx = ctx.transpose(0, 2, 1, 3).reshape(B, S, num_heads * dv)
    attn_out = mm(ctx, p["wo"].T) + p["bo"] + x
    yn = _layer_norm(attn_out, p["ln2_g"], p["ln2_b"], eps)
    h = _gelu_tanh(mm(yn, p["w1"].T) + p["b1"])
    return mm(h, p["w2"].T) + p["b2"] + attn_out


# ----------------------------------------------------------------------------
# Self-test at small shapes.
# ----------------------------------------------------------------------------
if __name__ == "__main__":
    B, S, D = 2, 8, 32            # batch, latent seq, q_dim
    H, WF = 1, 4                  # num_heads (module default), widening_factor
    Dh = WF * D

    key = jax.random.PRNGKey(0)
    ks = jax.random.split(key, 18)

    def make_linear(kw, kb, fan_in, fan_out):
        bound = 1.0 / math.sqrt(fan_in)
        w = jax.random.uniform(kw, (fan_out, fan_in), minval=-bound,
                               maxval=bound, dtype=jnp.float32)
        b = jax.random.uniform(kb, (fan_out,), minval=-bound,
                               maxval=bound, dtype=jnp.float32)
        return w, b

    x = jax.random.normal(ks[0], (B, S, D), dtype=jnp.float32)
    wq, bq = make_linear(ks[1], ks[2], D, D)
    wk, bk = make_linear(ks[3], ks[4], D, D)
    wv, bv = make_linear(ks[5], ks[6], D, D)
    wo, bo = make_linear(ks[7], ks[8], D, D)
    w1, b1 = make_linear(ks[9], ks[10], D, Dh)
    w2, b2 = make_linear(ks[11], ks[12], Dh, D)
    params = dict(
        wq=wq, bq=bq, wk=wk, bk=bk, wv=wv, bv=bv, wo=wo, bo=bo,
        w1=w1, b1=b1, w2=w2, b2=b2,
        ln1_g=1.0 + 0.1 * jax.random.normal(ks[13], (D,), dtype=jnp.float32),
        ln1_b=0.1 * jax.random.normal(ks[14], (D,), dtype=jnp.float32),
        ln2_g=1.0 + 0.1 * jax.random.normal(ks[15], (D,), dtype=jnp.float32),
        ln2_b=0.1 * jax.random.normal(ks[16], (D,), dtype=jnp.float32),
    )

    out = perceiver_layer(x, params, num_heads=H)
    out = jax.block_until_ready(out)

    ref = perceiver_layer_reference(x, params, num_heads=H)
    assert out.shape == (B, S, D)
    assert jnp.allclose(out, ref, atol=2e-3, rtol=2e-3), float(
        jnp.max(jnp.abs(out - ref)))

    print("KERNEL_OK")
</pallas_src>

<mosaic_0001>
module attributes {stable_mosaic.version = 11 : i64} {
  func.func @_perceiver_layer_kernel(%arg0: i32, %arg1: memref<1x8x32xf32, #tpu.memory_space<vmem>>, %arg2: memref<1x32xf32, #tpu.memory_space<vmem>>, %arg3: memref<1x32xf32, #tpu.memory_space<vmem>>, %arg4: memref<32x32xf32, #tpu.memory_space<vmem>>, %arg5: memref<1x32xf32, #tpu.memory_space<vmem>>, %arg6: memref<32x32xf32, #tpu.memory_space<vmem>>, %arg7: memref<1x32xf32, #tpu.memory_space<vmem>>, %arg8: memref<32x32xf32, #tpu.memory_space<vmem>>, %arg9: memref<1x32xf32, #tpu.memory_space<vmem>>, %arg10: memref<32x32xf32, #tpu.memory_space<vmem>>, %arg11: memref<1x32xf32, #tpu.memory_space<vmem>>, %arg12: memref<1x32xf32, #tpu.memory_space<vmem>>, %arg13: memref<1x32xf32, #tpu.memory_space<vmem>>, %arg14: memref<32x128xf32, #tpu.memory_space<vmem>>, %arg15: memref<1x128xf32, #tpu.memory_space<vmem>>, %arg16: memref<128x32xf32, #tpu.memory_space<vmem>>, %arg17: memref<1x32xf32, #tpu.memory_space<vmem>>, %arg18: memref<1x8x32xf32, #tpu.memory_space<vmem>>) attributes {dimension_semantics = [#tpu.dimension_semantics<parallel>], iteration_bounds = array<i64: 2>, scalar_prefetch = 0 : i64, scratch_operands = 0 : i64, tpu.core_type = #tpu.core_type<tc>, window_params = [{transform_indices = @transform_0, window_bounds = array<i64: 1, 8, 32>}, {pipeline_mode = #tpu.pipeline_mode<synchronous>, transform_indices = @transform_1, window_bounds = array<i64: 1, 32>}, {pipeline_mode = #tpu.pipeline_mode<synchronous>, transform_indices = @transform_2, window_bounds = array<i64: 1, 32>}, {pipeline_mode = #tpu.pipeline_mode<synchronous>, transform_indices = @transform_3, window_bounds = array<i64: 32, 32>}, {pipeline_mode = #tpu.pipeline_mode<synchronous>, transform_indices = @transform_4, window_bounds = array<i64: 1, 32>}, {pipeline_mode = #tpu.pipeline_mode<synchronous>, transform_indices = @transform_5, window_bounds = array<i64: 32, 32>}, {pipeline_mode = #tpu.pipeline_mode<synchronous>, transform_indices = @transform_6, window_bounds = array<i64: 1, 32>}, {pipeline_mode = #tpu.pipeline_mode<synchronous>, transform_indices = @transform_7, window_bounds = array<i64: 32, 32>}, {pipeline_mode = #tpu.pipeline_mode<synchronous>, transform_indices = @transform_8, window_bounds = array<i64: 1, 32>}, {pipeline_mode = #tpu.pipeline_mode<synchronous>, transform_indices = @transform_9, window_bounds = array<i64: 32, 32>}, {pipeline_mode = #tpu.pipeline_mode<synchronous>, transform_indices = @transform_10, window_bounds = array<i64: 1, 32>}, {pipeline_mode = #tpu.pipeline_mode<synchronous>, transform_indices = @transform_11, window_bounds = array<i64: 1, 32>}, {pipeline_mode = #tpu.pipeline_mode<synchronous>, transform_indices = @transform_12, window_bounds = array<i64: 1, 32>}, {pipeline_mode = #tpu.pipeline_mode<synchronous>, transform_indices = @transform_13, window_bounds = array<i64: 32, 128>}, {pipeline_mode = #tpu.pipeline_mode<synchronous>, transform_indices = @transform_14, window_bounds = array<i64: 1, 128>}, {pipeline_mode = #tpu.pipeline_mode<synchronous>, transform_indices = @transform_15, window_bounds = array<i64: 128, 32>}, {pipeline_mode = #tpu.pipeline_mode<synchronous>, transform_indices = @transform_16, window_bounds = array<i64: 1, 32>}, {transform_indices = @transform_17, window_bounds = array<i64: 1, 8, 32>}]} {
    %c0 = arith.constant 0 : index
    %c0_0 = arith.constant 0 : index
    %c0_1 = arith.constant 0 : index
    %0 = vector.load %arg1[%c0, %c0_0, %c0_1] : memref<1x8x32xf32, #tpu.memory_space<vmem>>, vector<1x8x32xf32>
    %1 = vector.shape_cast %0 : vector<1x8x32xf32> to vector<8x32xf32>
    %c0_2 = arith.constant 0 : index
    %c0_3 = arith.constant 0 : index
    %2 = vector.load %arg2[%c0_2, %c0_3] : memref<1x32xf32, #tpu.memory_space<vmem>>, vector<1x32xf32>
    %c0_4 = arith.constant 0 : index
    %c0_5 = arith.constant 0 : index
    %3 = vector.load %arg3[%c0_4, %c0_5] : memref<1x32xf32, #tpu.memory_space<vmem>>, vector<1x32xf32>
    %cst = arith.constant dense<0.000000e+00> : vector<8xf32>
    %4 = vector.multi_reduction <add>, %1, %cst [1] : vector<8x32xf32> to vector<8xf32>
    %5 = vector.shape_cast %4 : vector<8xf32> to vector<8x1xf32>
    %cst_6 = arith.constant 3.200000e+01 : f32
    %6 = vector.broadcast %cst_6 : f32 to vector<8x1xf32>
    %7 = arith.divf %5, %6 : vector<8x1xf32>
    %8 = vector.broadcast %7 : vector<8x1xf32> to vector<8x32xf32>
    %9 = arith.subf %1, %8 : vector<8x32xf32>
    %10 = arith.mulf %9, %9 : vector<8x32xf32>
    %cst_7 = arith.constant dense<0.000000e+00> : vector<8xf32>
    %11 = vector.multi_reduction <add>, %10, %cst_7 [1] : vector<8x32xf32> to vector<8xf32>
    %12 = vector.shape_cast %11 : vector<8xf32> to vector<8x1xf32>
    %cst_8 = arith.constant 3.200000e+01 : f32
    %13 = vector.broadcast %cst_8 : f32 to vector<8x1xf32>
    %14 = arith.divf %12, %13 : vector<8x1xf32>
    %15 = vector.broadcast %7 : vector<8x1xf32> to vector<8x32xf32>
    %16 = arith.subf %1, %15 : vector<8x32xf32>
    %cst_9 = arith.constant 9.99999974E-6 : f32
    %17 = vector.broadcast %cst_9 : f32 to vector<8x1xf32>
    %18 = arith.addf %14, %17 : vector<8x1xf32>
    %19 = math.rsqrt %18 : vector<8x1xf32>
    %20 = vector.broadcast %19 : vector<8x1xf32> to vector<8x32xf32>
    %21 = arith.mulf %16, %20 : vector<8x32xf32>
    %22 = vector.broadcast %2 : vector<1x32xf32> to vector<8x32xf32>
    %23 = arith.mulf %21, %22 : vector<8x32xf32>
    %24 = vector.broadcast %3 : vector<1x32xf32> to vector<8x32xf32>
    %25 = arith.addf %23, %24 : vector<8x32xf32>
    %c0_10 = arith.constant 0 : index
    %c0_11 = arith.constant 0 : index
    %26 = vector.load %arg4[%c0_10, %c0_11] : memref<32x32xf32, #tpu.memory_space<vmem>>, vector<32x32xf32>
    %cst_12 = arith.constant dense<0.000000e+00> : vector<8x32xf32>
    %27 = tpu.matmul %25, %26, %cst_12 {dimension_numbers = #tpu.dot_dimension_numbers<[1], [0], [0], [1], [0, 0, 1, 1], [], []>} : vector<8x32xf32>, vector<32x32xf32>, vector<8x32xf32> -> vector<8x32xf32>
    %c0_13 = arith.constant 0 : index
    %c0_14 = arith.constant 0 : index
    %28 = vector.load %arg5[%c0_13, %c0_14] : memref<1x32xf32, #tpu.memory_space<vmem>>, vector<1x32xf32>
    %29 = vector.broadcast %28 : vector<1x32xf32> to vector<8x32xf32>
    %30 = arith.addf %27, %29 : vector<8x32xf32>
    %c0_15 = arith.constant 0 : index
    %c0_16 = arith.constant 0 : index
    %31 = vector.load %arg6[%c0_15, %c0_16] : memref<32x32xf32, #tpu.memory_space<vmem>>, vector<32x32xf32>
    %cst_17 = arith.constant dense<0.000000e+00> : vector<8x32xf32>
    %32 = tpu.matmul %25, %31, %cst_17 {dimension_numbers = #tpu.dot_dimension_numbers<[1], [0], [0], [1], [0, 0, 1, 1], [], []>} : vector<8x32xf32>, vector<32x32xf32>, vector<8x32xf32> -> vector<8x32xf32>
    %c0_18 = arith.constant 0 : index
    %c0_19 = arith.constant 0 : index
    %33 = vector.load %arg7[%c0_18, %c0_19] : memref<1x32xf32, #tpu.memory_space<vmem>>, vector<1x32xf32>
    %34 = vector.broadcast %33 : vector<1x32xf32> to vector<8x32xf32>
    %35 = arith.addf %32, %34 : vector<8x32xf32>
    %c0_20 = arith.constant 0 : index
    %c0_21 = arith.constant 0 : index
    %36 = vector.load %arg8[%c0_20, %c0_21] : memref<32x32xf32, #tpu.memory_space<vmem>>, vector<32x32xf32>
    %cst_22 = arith.constant dense<0.000000e+00> : vector<8x32xf32>
    %37 = tpu.matmul %25, %36, %cst_22 {dimension_numbers = #tpu.dot_dimension_numbers<[1], [0], [0], [1], [0, 0, 1, 1], [], []>} : vector<8x32xf32>, vector<32x32xf32>, vector<8x32xf32> -> vector<8x32xf32>
    %c0_23 = arith.constant 0 : index
    %c0_24 = arith.constant 0 : index
    %38 = vector.load %arg9[%c0_23, %c0_24] : memref<1x32xf32, #tpu.memory_space<vmem>>, vector<1x32xf32>
    %39 = vector.broadcast %38 : vector<1x32xf32> to vector<8x32xf32>
    %40 = arith.addf %37, %39 : vector<8x32xf32>
    %cst_25 = arith.constant dense<0.000000e+00> : vector<8x8xf32>
    %41 = tpu.matmul %30, %35, %cst_25 {dimension_numbers = #tpu.dot_dimension_numbers<[1], [1], [0], [0], [0, 0, 1, 0], [], []>} : vector<8x32xf32>, vector<8x32xf32>, vector<8x8xf32> -> vector<8x8xf32>
    %cst_26 = arith.constant 0.176776692 : f32
    %42 = vector.broadcast %cst_26 : f32 to vector<8x8xf32>
    %43 = arith.mulf %41, %42 : vector<8x8xf32>
    %cst_27 = arith.constant dense<0xFF800000> : vector<8xf32>
    %44 = vector.multi_reduction <maximumf>, %43, %cst_27 [1] : vector<8x8xf32> to vector<8xf32>
    %45 = vector.shape_cast %44 : vector<8xf32> to vector<8x1xf32>
    %46 = vector.broadcast %45 : vector<8x1xf32> to vector<8x8xf32>
    %47 = arith.subf %43, %46 : vector<8x8xf32>
    %48 = math.exp %47 : vector<8x8xf32>
    %cst_28 = arith.constant dense<0.000000e+00> : vector<8xf32>
    %49 = vector.multi_reduction <add>, %48, %cst_28 [1] : vector<8x8xf32> to vector<8xf32>
    %50 = vector.shape_cast %49 : vector<8xf32> to vector<8x1xf32>
    %51 = vector.broadcast %50 : vector<8x1xf32> to vector<8x8xf32>
    %52 = arith.divf %48, %51 : vector<8x8xf32>
    %cst_29 = arith.constant dense<0.000000e+00> : vector<8x32xf32>
    %53 = tpu.matmul %52, %40, %cst_29 {dimension_numbers = #tpu.dot_dimension_numbers<[1], [0], [0], [1], [0, 0, 1, 1], [], []>} : vector<8x8xf32>, vector<8x32xf32>, vector<8x32xf32> -> vector<8x32xf32>
    %c0_30 = arith.constant 0 : index
    %c0_31 = arith.constant 0 : index
    %54 = vector.load %arg10[%c0_30, %c0_31] : memref<32x32xf32, #tpu.memory_space<vmem>>, vector<32x32xf32>
    %cst_32 = arith.constant dense<0.000000e+00> : vector<8x32xf32>
    %55 = tpu.matmul %53, %54, %cst_32 {dimension_numbers = #tpu.dot_dimension_numbers<[1], [0], [0], [1], [0, 0, 1, 1], [], []>} : vector<8x32xf32>, vector<32x32xf32>, vector<8x32xf32> -> vector<8x32xf32>
    %c0_33 = arith.constant 0 : index
    %c0_34 = arith.constant 0 : index
    %56 = vector.load %arg11[%c0_33, %c0_34] : memref<1x32xf32, #tpu.memory_space<vmem>>, vector<1x32xf32>
    %57 = vector.broadcast %56 : vector<1x32xf32> to vector<8x32xf32>
    %58 = arith.addf %55, %57 : vector<8x32xf32>
    %59 = arith.addf %58, %1 : vector<8x32xf32>
    %c0_35 = arith.constant 0 : index
    %c0_36 = arith.constant 0 : index
    %60 = vector.load %arg12[%c0_35, %c0_36] : memref<1x32xf32, #tpu.memory_space<vmem>>, vector<1x32xf32>
    %c0_37 = arith.constant 0 : index
    %c0_38 = arith.constant 0 : index
    %61 = vector.load %arg13[%c0_37, %c0_38] : memref<1x32xf32, #tpu.memory_space<vmem>>, vector<1x32xf32>
    %cst_39 = arith.constant dense<0.000000e+00> : vector<8xf32>
    %62 = vector.multi_reduction <add>, %59, %cst_39 [1] : vector<8x32xf32> to vector<8xf32>
    %63 = vector.shape_cast %62 : vector<8xf32> to vector<8x1xf32>
    %cst_40 = arith.constant 3.200000e+01 : f32
    %64 = vector.broadcast %cst_40 : f32 to vector<8x1xf32>
    %65 = arith.divf %63, %64 : vector<8x1xf32>
    %66 = vector.broadcast %65 : vector<8x1xf32> to vector<8x32xf32>
    %67 = arith.subf %59, %66 : vector<8x32xf32>
    %68 = arith.mulf %67, %67 : vector<8x32xf32>
    %cst_41 = arith.constant dense<0.000000e+00> : vector<8xf32>
    %69 = vector.multi_reduction <add>, %68, %cst_41 [1] : vector<8x32xf32> to vector<8xf32>
    %70 = vector.shape_cast %69 : vector<8xf32> to vector<8x1xf32>
    %cst_42 = arith.constant 3.200000e+01 : f32
    %71 = vector.broadcast %cst_42 : f32 to vector<8x1xf32>
    %72 = arith.divf %70, %71 : vector<8x1xf32>
    %73 = vector.broadcast %65 : vector<8x1xf32> to vector<8x32xf32>
    %74 = arith.subf %59, %73 : vector<8x32xf32>
    %cst_43 = arith.constant 9.99999974E-6 : f32
    %75 = vector.broadcast %cst_43 : f32 to vector<8x1xf32>
    %76 = arith.addf %72, %75 : vector<8x1xf32>
    %77 = math.rsqrt %76 : vector<8x1xf32>
    %78 = vector.broadcast %77 : vector<8x1xf32> to vector<8x32xf32>
    %79 = arith.mulf %74, %78 : vector<8x32xf32>
    %80 = vector.broadcast %60 : vector<1x32xf32> to vector<8x32xf32>
    %81 = arith.mulf %79, %80 : vector<8x32xf32>
    %82 = vector.broadcast %61 : vector<1x32xf32> to vector<8x32xf32>
    %83 = arith.addf %81, %82 : vector<8x32xf32>
    %c0_44 = arith.constant 0 : index
    %c0_45 = arith.constant 0 : index
    %84 = vector.load %arg14[%c0_44, %c0_45] : memref<32x128xf32, #tpu.memory_space<vmem>>, vector<32x128xf32>
    %cst_46 = arith.constant dense<0.000000e+00> : vector<8x128xf32>
    %85 = tpu.matmul %83, %84, %cst_46 {dimension_numbers = #tpu.dot_dimension_numbers<[1], [0], [0], [1], [0, 0, 1, 1], [], []>} : vector<8x32xf32>, vector<32x128xf32>, vector<8x128xf32> -> vector<8x128xf32>
    %c0_47 = arith.constant 0 : index
    %c0_48 = arith.constant 0 : index
    %86 = vector.load %arg15[%c0_47, %c0_48] : memref<1x128xf32, #tpu.memory_space<vmem>>, vector<1x128xf32>
    %87 = vector.broadcast %86 : vector<1x128xf32> to vector<8x128xf32>
    %88 = arith.addf %85, %87 : vector<8x128xf32>
    %cst_49 = arith.constant 5.000000e-01 : f32
    %89 = vector.broadcast %cst_49 : f32 to vector<8x128xf32>
    %90 = arith.mulf %89, %88 : vector<8x128xf32>
    %cst_50 = arith.constant 4.471500e-02 : f32
    %91 = vector.broadcast %cst_50 : f32 to vector<8x128xf32>
    %92 = arith.mulf %91, %88 : vector<8x128xf32>
    %93 = arith.mulf %92, %88 : vector<8x128xf32>
    %94 = arith.mulf %93, %88 : vector<8x128xf32>
    %95 = arith.addf %88, %94 : vector<8x128xf32>
    %cst_51 = arith.constant 0.797884583 : f32
    %96 = vector.broadcast %cst_51 : f32 to vector<8x128xf32>
    %97 = arith.mulf %96, %95 : vector<8x128xf32>
    %98 = math.tanh %97 : vector<8x128xf32>
    %cst_52 = arith.constant 1.000000e+00 : f32
    %99 = vector.broadcast %cst_52 : f32 to vector<8x128xf32>
    %100 = arith.addf %99, %98 : vector<8x128xf32>
    %101 = arith.mulf %90, %100 : vector<8x128xf32>
    %c0_53 = arith.constant 0 : index
    %c0_54 = arith.constant 0 : index
    %102 = vector.load %arg16[%c0_53, %c0_54] : memref<128x32xf32, #tpu.memory_space<vmem>>, vector<128x32xf32>
    %cst_55 = arith.constant dense<0.000000e+00> : vector<8x32xf32>
    %103 = tpu.matmul %101, %102, %cst_55 {dimension_numbers = #tpu.dot_dimension_numbers<[1], [0], [0], [1], [0, 0, 1, 1], [], []>} : vector<8x128xf32>, vector<128x32xf32>, vector<8x32xf32> -> vector<8x32xf32>
    %c0_56 = arith.constant 0 : index
    %c0_57 = arith.constant 0 : index
    %104 = vector.load %arg17[%c0_56, %c0_57] : memref<1x32xf32, #tpu.memory_space<vmem>>, vector<1x32xf32>
    %105 = vector.broadcast %104 : vector<1x32xf32> to vector<8x32xf32>
    %106 = arith.addf %103, %105 : vector<8x32xf32>
    %107 = arith.addf %106, %59 : vector<8x32xf32>
    %c0_58 = arith.constant 0 : index
    %c0_59 = arith.constant 0 : index
    %c0_60 = arith.constant 0 : index
    %108 = vector.load %arg18[%c0_58, %c0_59, %c0_60] : memref<1x8x32xf32, #tpu.memory_space<vmem>>, vector<1x8x32xf32>
    %109 = vector.shape_cast %108 : vector<1x8x32xf32> to vector<8x32xf32>
    %110 = vector.shape_cast %107 : vector<8x32xf32> to vector<1x8x32xf32>
    tpu.vector_store %arg18[%c0_58, %c0_59, %c0_60], %110 {strides = array<i32>} : memref<1x8x32xf32, #tpu.memory_space<vmem>>, vector<1x8x32xf32>,
    return
  }
  func.func @transform_0(%arg0: i32) -> (i32, i32, i32) {
    %c0_i32 = arith.constant 0 : i32
    %c0_i32_0 = arith.constant 0 : i32
    %c0_i32_1 = arith.constant 0 : i32
    return %arg0, %c0_i32, %c0_i32_0 : i32, i32, i32
  }
  func.func @transform_1(%arg0: i32) -> (i32, i32) {
    %c0_i32 = arith.constant 0 : i32
    %c0_i32_0 = arith.constant 0 : i32
    %c0_i32_1 = arith.constant 0 : i32
    return %c0_i32, %c0_i32_0 : i32, i32
  }
  func.func @transform_2(%arg0: i32) -> (i32, i32) {
    %c0_i32 = arith.constant 0 : i32
    %c0_i32_0 = arith.constant 0 : i32
    %c0_i32_1 = arith.constant 0 : i32
    return %c0_i32, %c0_i32_0 : i32, i32
  }
  func.func @transform_3(%arg0: i32) -> (i32, i32) {
    %c0_i32 = arith.constant 0 : i32
    %c0_i32_0 = arith.constant 0 : i32
    %c0_i32_1 = arith.constant 0 : i32
    return %c0_i32, %c0_i32_0 : i32, i32
  }
  func.func @transform_4(%arg0: i32) -> (i32, i32) {
    %c0_i32 = arith.constant 0 : i32
    %c0_i32_0 = arith.constant 0 : i32
    %c0_i32_1 = arith.constant 0 : i32
    return %c0_i32, %c0_i32_0 : i32, i32
  }
  func.func @transform_5(%arg0: i32) -> (i32, i32) {
    %c0_i32 = arith.constant 0 : i32
    %c0_i32_0 = arith.constant 0 : i32
    %c0_i32_1 = arith.constant 0 : i32
    return %c0_i32, %c0_i32_0 : i32, i32
  }
  func.func @transform_6(%arg0: i32) -> (i32, i32) {
    %c0_i32 = arith.constant 0 : i32
    %c0_i32_0 = arith.constant 0 : i32
    %c0_i32_1 = arith.constant 0 : i32
    return %c0_i32, %c0_i32_0 : i32, i32
  }
  func.func @transform_7(%arg0: i32) -> (i32, i32) {
    %c0_i32 = arith.constant 0 : i32
    %c0_i32_0 = arith.constant 0 : i32
    %c0_i32_1 = arith.constant 0 : i32
    return %c0_i32, %c0_i32_0 : i32, i32
  }
  func.func @transform_8(%arg0: i32) -> (i32, i32) {
    %c0_i32 = arith.constant 0 : i32
    %c0_i32_0 = arith.constant 0 : i32
    %c0_i32_1 = arith.constant 0 : i32
    return %c0_i32, %c0_i32_0 : i32, i32
  }
  func.func @transform_9(%arg0: i32) -> (i32, i32) {
    %c0_i32 = arith.constant 0 : i32
    %c0_i32_0 = arith.constant 0 : i32
    %c0_i32_1 = arith.constant 0 : i32
    return %c0_i32, %c0_i32_0 : i32, i32
  }
  func.func @transform_10(%arg0: i32) -> (i32, i32) {
    %c0_i32 = arith.constant 0 : i32
    %c0_i32_0 = arith.constant 0 : i32
    %c0_i32_1 = arith.constant 0 : i32
    return %c0_i32, %c0_i32_0 : i32, i32
  }
  func.func @transform_11(%arg0: i32) -> (i32, i32) {
    %c0_i32 = arith.constant 0 : i32
    %c0_i32_0 = arith.constant 0 : i32
    %c0_i32_1 = arith.constant 0 : i32
    return %c0_i32, %c0_i32_0 : i32, i32
  }
  func.func @transform_12(%arg0: i32) -> (i32, i32) {
    %c0_i32 = arith.constant 0 : i32
    %c0_i32_0 = arith.constant 0 : i32
    %c0_i32_1 = arith.constant 0 : i32
    return %c0_i32, %c0_i32_0 : i32, i32
  }
  func.func @transform_13(%arg0: i32) -> (i32, i32) {
    %c0_i32 = arith.constant 0 : i32
    %c0_i32_0 = arith.constant 0 : i32
    %c0_i32_1 = arith.constant 0 : i32
    return %c0_i32, %c0_i32_0 : i32, i32
  }
  func.func @transform_14(%arg0: i32) -> (i32, i32) {
    %c0_i32 = arith.constant 0 : i32
    %c0_i32_0 = arith.constant 0 : i32
    %c0_i32_1 = arith.constant 0 : i32
    return %c0_i32, %c0_i32_0 : i32, i32
  }
  func.func @transform_15(%arg0: i32) -> (i32, i32) {
    %c0_i32 = arith.constant 0 : i32
    %c0_i32_0 = arith.constant 0 : i32
    %c0_i32_1 = arith.constant 0 : i32
    return %c0_i32, %c0_i32_0 : i32, i32
  }
  func.func @transform_16(%arg0: i32) -> (i32, i32) {
    %c0_i32 = arith.constant 0 : i32
    %c0_i32_0 = arith.constant 0 : i32
    %c0_i32_1 = arith.constant 0 : i32
    return %c0_i32, %c0_i32_0 : i32, i32
  }
  func.func @transform_17(%arg0: i32) -> (i32, i32, i32) {
    %c0_i32 = arith.constant 0 : i32
    %c0_i32_0 = arith.constant 0 : i32
    %c0_i32_1 = arith.constant 0 : i32
    return %arg0, %c0_i32, %c0_i32_0 : i32, i32, i32
  }
}

</mosaic_0001>

<bundles_post_ra>
// kernel: tpu_custom_call.1
= control target key start
LH: loop header
LB: loop body
LE: loop exit
PB: predicated region body
PF: predicated region fallthrough
CT: control target
= control target key end

     0   :  { %s1660_s0 = inlined_call_operand.hbm [shape: f32[2,8,32], index: 0, kind: input, shape index: {}]   ;;  %s1661_s1 = inlined_call_operand.hbm [shape: f32[1,32], index: 1, kind: input, shape index: {}]   ;;  %s1662_s2 = inlined_call_operand.vmem [shape: f32[1,32], index: 2, kind: input, shape index: {}]   ;;  %s1663_s3 = inlined_call_operand.vmem [shape: f32[32,32], index: 3, kind: input, shape index: {}]   ;;  %s1664_s4 = inlined_call_operand.vmem [shape: f32[1,32], index: 4, kind: input, shape index: {}]   ;;  %s1665_s5 = inlined_call_operand.vmem [shape: f32[32,32], index: 5, kind: input, shape index: {}]   ;;  %s1666_s6 = inlined_call_operand.vmem [shape: f32[1,32], index: 6, kind: input, shape index: {}]   ;;  %s1667_s7 = inlined_call_operand.vmem [shape: f32[32,32], index: 7, kind: input, shape index: {}]   ;;  %s1668_s8 = inlined_call_operand.vmem [shape: f32[1,32], index: 8, kind: input, shape index: {}]   ;;  %s1669_s9 = inlined_call_operand.vmem [shape: f32[32,32], index: 9, kind: input, shape index: {}]   ;;  %s1670_s10 = inlined_call_operand.vmem [shape: f32[1,32], index: 10, kind: input, shape index: {}]   ;;  %s1671_s11 = inlined_call_operand.vmem [shape: f32[1,32], index: 11, kind: input, shape index: {}]   ;;  %s1672_s12 = inlined_call_operand.vmem [shape: f32[1,32], index: 12, kind: input, shape index: {}]   ;;  %s1673_s13 = inlined_call_operand.vmem [shape: f32[32,128], index: 13, kind: input, shape index: {}]   ;;  %s1674_s14 = inlined_call_operand.vmem [shape: f32[1,128], index: 14, kind: input, shape index: {}]   ;;  %s1675_s15 = inlined_call_operand.vmem [shape: f32[128,32], index: 15, kind: input, shape index: {}]   ;;  %s1676_s16 = inlined_call_operand.vmem [shape: f32[1,32], index: 16, kind: input, shape index: {}]   ;;  %s1677_s17 = inlined_call_operand.hbm [shape: f32[2,8,32], index: 17, kind: output, shape index: {}]  }
   0x1   :  { %1687 = sst [smem:[#allocation17_spill]] %s1660_s0 }
   0x2   :  { %1688 = sst [smem:[#allocation18_spill]] %s1661_s1 }
   0x3   :  { %1689 = sst [smem:[#allocation19_spill]] %s1672_s12 }
   0x4   :  { %1690 = sst [smem:[#allocation20_spill]] %s1674_s14 }
   0x5   :  { %1691 = sst [smem:[#allocation21_spill]] %s1676_s16 }
   0x6   :  { %1692 = sst [smem:[#allocation22_spill]] %s1677_s17 }
   0x7   :  { %22 = vsyncpa [#allocation3], 0 }
   0x8   :  { %24 = vsyncpa [#allocation3 + $0x1], 0 }
   0x9   :  { %25 = vsyncpa [#allocation6], 0 }
   0xa   :  { %26 = vsyncpa [#allocation4], 0 }
   0xb   :  { %28 = vsyncpa [#allocation4 + $0x1], 0  ;;  %s1352_s24 = smov 0   ;;  %s1354_s25 = smov 0  }
   0xc   :  { %s1356_s26 = smov 0   ;;  %s1358_s27 = smov 0  }
   0xd LB: > { %1693 = sst [smem:[#allocation11_spill]] %s1246_s24  ;;  %s1373_s28 = sadd.s32 4294967295, %s1258_s27   ;;  %s1258_s27 = sphi %s1358_s27, %s1714_s27   ;;  %s1254_s26 = sphi %s1356_s26, %s1716_s26   ;;  %s1250_s25 = sphi %s1354_s25, %s1718_s25   ;;  %s1246_s24 = sphi %s1352_s24, %s1717_s24  }
   0xe   : > { %1694 = sst [smem:[#allocation12_spill]] %s1254_s26  ;;  %s1026_s29 = sadd.s32 4294967294, %s1258_s27  }
   0xf   : > { %p54_p0 = scmp.ne.s32.totalorder %s1250_s25, %s1246_s24  ;;  %p55_p1 = scmp.eq.s32.totalorder %s1373_s28, 0 }
  0x10   : > { %p414_p2 = scmp.eq.s32.totalorder %s1373_s28, 1  ;;  %p420_p3 = scmp.eq.s32.totalorder %s1026_s29, 1 }
  0x11   : > { %p1382_p4 = por %p55_p1, %p54_p0  ;;  %p1027_p5 = scmp.ge.s32.totalorder %s1258_s27, 1 }
  0x12   : > { %p1387_p6 = por %p420_p3, %p54_p0  ;;  %p427_p7 = scmp.lt.s32.totalorder %s1258_s27, 3 }
  0x13   : > { %s1698_s1 = sld [smem:[#allocation18_spill]]  ;;  %s1260_s22 = smov [#allocation5]  }
  0x14   : > { %s1696_s30 = scalar_select %p1387_p6, 1, 0 }
  0x15   : > { %p1395_p8 = pnand %p1027_p5, %p427_p7  ;;  %s441_s23 = sshll.u32 %s1260_s22, 4  ;;  %s442_s23 = int_to_ptr.vmem [resolvable:$true] %s441_s23 }
  0x16   : > { %1697 = sst [smem:[#allocation13_spill]] %s1696_s30  ;;  %s1405_s29 = sadd.s32 1, %s1258_s27  }
  0x17   : > { %p1056_p10 = pneg %p1395_p8  ;;  %1700 = sst [smem:[#allocation14_spill]] %s1405_s29 }
  0x18   : > { %s41_s18 = sadd.s32 1, %s1254_s26  ;;  %s38_s19 = ssub.s32 %s1258_s27, %s1405_s29 }
  0x19   : > { %s439_s20 = sshll.u32 %s1698_s1, 4  ;;  %p1057_p11 = pnand %p1056_p10, %p55_p1  ;;  %s440_s20 = int_to_ptr.hbm [resolvable:$true] %s439_s20 }
  0x1a   : > { %p39_p12 = scmp.eq.s32.totalorder %s38_s19, 0  ;;  %p48_p13 = scmp.ne.s32.totalorder %s1254_s26, %s1250_s25 }
  0x1b   : > { %1059 = dma.hbm_to_vmem [thread:$0]  (!%p1057_p11), %s440_s20, 16, %s442_s23, [#allocation6]  }
  0x1c   : > { %p49_p0 = scmp.eq.s32.totalorder %s1258_s27, 0  ;;  %p1418_p3 = por %p414_p2, %p48_p13 }
  0x1d   : > { %s1414_s1 = scalar_select %p39_p12, %s1254_s26, %s41_s18  }
  0x1e   : > { %s1702_s30 = scalar_select %p1418_p3, 1, 0 }
  0x1f   : > { %1701 = sst [smem:[#allocation15_spill]] %s1414_s1  ;;  %p1069_p5 = scmp.lt.s32.totalorder %s1258_s27, 2 }
  0x20   : > { %1703 = sst [smem:[#allocation16_spill]] %s1702_s30  ;;  %s497_s22 = sand.u32 1, %s1254_s26  }
  0x21   : > { %s1031_s24 = sshll.u32 %s1258_s27, 3  ;;  %p50_p7 = por %p49_p0, %p48_p13 }
  0x22   : > { %s1030_s17 = sshll.u32 %s497_s22, 3  ;;  %s1704_s12 = sld [smem:[#allocation17_spill]] }
  0x23   : > { %s501_s23 = scalar_lea.vmem [#allocation2], %s1030_s17  ;;  %p1428_p10 = pnand %p1069_p5, %p50_p7 }
  0x24   : > { %s509_s19 = sshll.u32 %s501_s23, 4  ;;  %s498_s1 = scalar_lea.sflag [#allocation3], %s497_s22  ;;  %s510_s19 = int_to_ptr.vmem [resolvable:$true] %s509_s19 }
  0x25   : > { %p1162_p11 = pneg %p1428_p10 }
  0x28   : > { %s505_s29 = scalar_lea.hbm %s1704_s12, %s1031_s24  ;;  %s1165_s17 = scalar_lea.hbm %s1704_s12, 16 }
  0x29   : > { %s507_s20 = sshll.u32 %s505_s29, 4  ;;  %s508_s20 = int_to_ptr.hbm [resolvable:$true] %s507_s20 }
  0x2a   : > { %s1158_s30 = sshra.s32 %s508_s20, 4  ;;  %s1159_s30 = int_to_ptr.hbm [resolvable:$true] %s1158_s30 }
  0x2b   : > { %s1160_s26 = scalar_lea.hbm %s1159_s30, 8  ;;  %p1166_p0 = scmp.lt.s32.totalorder %s1159_s30, %s1704_s12 }
  0x2c   : > { %p1161_p2 = scmp.ne.s32.totalorder %s1159_s30, %s1160_s26  ;;  %p1167_p5 = scmp.lt.s32.totalorder %s1165_s17, %s1160_s26 }
  0x2e   : > { %p1163_p12 = pnand %p1162_p11, %p1161_p2  ;;  %p1168_p7 = por %p1167_p5, %p1166_p0 }
  0x30   : > { %p1164_p13 = pneg %p1163_p12 }
  0x32   : > { %p1169_p9 = pnand %p1168_p7, %p1164_p13 }
  0x34   : > { %1172 = shalt.err (!%p1169_p9)
}
  0x35   : > { %1063 = dma.hbm_to_vmem [thread:$0]  (!%p1428_p10), %s508_s20, 128, %s510_s19, %s498_s1  }
  0x36   : > { %518 = sbr.rel (%p1395_p8) target bundleno = 1678 (0x68e), region = 88  ;;  %s1445_s22 = sand.u32 (!%p1395_p8), 1, %s1250_s25  }
  0x37   : > { %s1033_s23 = sshll.u32 (!%p1395_p8), %s1445_s22, 3  ;;  %s521_s14 = scalar_lea.sflag (!%p1395_p8), [#allocation3], %s1445_s22 }
  0x38   : > { %s524_s26 = scalar_lea.vmem (!%p1395_p8), [#allocation2], %s1033_s23 }
  0x3b   : > { %1233 = dma.done.wait (%p1382_p4), %s521_s14, 128  }
  0x3c   : > { %1235 = vsyncadd (%p1382_p4), %s521_s14, 4294967168 }
  0x3d   : > { %1237 = dma.done.wait (%p55_p1), [#allocation6], 16  }
  0x3e   : > { %1239 = vsyncadd (%p55_p1), [#allocation6], 4294967280  ;;  %vm584_vm0 = vcmask 261120   ;;  %v1459_v0 = vld [vmem:[%s524_s26] sm:$0xff]  ;;  %v1261_v2 = vmov 32.0   ;;  %v625_v14 = vld [vmem:[%s1663_s3 + $0x18] sm:$0xff] }
  0x3f   : > { %v585_v1 = vsel %vm584_vm0, %v1459_v0, 0.0  ;;  %1116 = vrcp.f32 %v1261_v2  ;;  %v656_v15 = vld [vmem:[%s1665_s5 + $0x18] sm:$0xff]  ;;  %645 = vmatpush.msra.mxu0 %v625_v14  ;;  %v624_v17 = vld [vmem:[%s1663_s3 + $0x10] sm:$0xff]  ;;  %v623_v20 = vld [vmem:[%s1663_s3 + $0x8] sm:$0xff]  ;;  %vm736_vm5 = vcmask 64512   ;;  %s1706_s29 = sld [smem:[#allocation19_spill]] }
  0x40   : > { %586 = vadd.xlane.f32.xlu0 %v585_v1  ;;  %v684_v16 = vld [vmem:[%s1667_s7 + $0x18] sm:$0xff]  ;;  %673 = vmatpush.msra.mxu1 %v656_v15  ;;  %v655_v18 = vld [vmem:[%s1665_s5 + $0x10] sm:$0xff]  ;;  %v654_v21 = vld [vmem:[%s1665_s5 + $0x8] sm:$0xff]  ;;  %s1707_s14 = sld [smem:[#allocation20_spill]]  ;;  %s1045_s26 = sshll.u32 %s1373_s28, 3 }
  0x41   : > { %v683_v19 = vld [vmem:[%s1667_s7 + $0x10] sm:$0xff]  ;;  %701 = vmatpush.msra.mxu3 %v684_v16  ;;  %646 = vmatpush.msra.mxu0 %v624_v17  ;;  %v682_v22 = vld [vmem:[%s1667_s7 + $0x8] sm:$0xff]  ;;  %v622_v23 = vld [vmem:[%s1663_s3] sm:$0xff]  ;;  %s1708_s21 = sld [smem:[#allocation21_spill]]  ;;  %s580_s17 = scalar_lea.vmem [#allocation7], %s1033_s23 }
  0x42   : > { %674 = vmatpush.msra.mxu1 %v655_v18  ;;  %v653_v24 = vld [vmem:[%s1665_s5] sm:$0xff]  ;;  %v1106_v35 = vld [vmem:[#allocation5] ss:$0 sm:$0xff]  ;;  %v787_v58 = vld [vmem:[%s1669_s9 + $0x18] sm:$0xff]  ;;  %s1709_s19 = sld [smem:[#allocation22_spill]]  ;;  %s943_s24 = sshll.u32 %s580_s17, 4  ;;  %s944_s24 = int_to_ptr.vmem [resolvable:$true] %s943_s24 }
  0x43   : > { %702 = vmatpush.msra.mxu3 %v683_v19  ;;  %647 = vmatpush.msra.mxu0 %v623_v20  ;;  %v681_v25 = vld [vmem:[%s1667_s7] sm:$0xff]  ;;  %v786_v59 = vld [vmem:[%s1669_s9 + $0x10] sm:$0xff]  ;;  %v785_v60 = vld [vmem:[%s1669_s9 + $0x8] sm:$0xff]  ;;  %s931_s28 = scalar_lea.sflag [#allocation4], %s1445_s22 }
  0x44   : > { %675 = vmatpush.msra.mxu1 %v654_v21  ;;  %v1107_v38 = vld [vmem:[%s1662_s2] ss:$0 sm:$0xff] }
  0x45   : > { %v1117_v3 = vpop.eup %1116  ;;  %703 = vmatpush.msra.mxu3 %v682_v22  ;;  %648 = vmatpush.msra.mxu0 %v622_v23  ;;  %v1109_v41 = vld [vmem:[%s1666_s6] ss:$0 sm:$0xff]  ;;  %v851_v23 = vld [vmem:[%s1673_s13 + $0x18] sm:$0xff] }
  0x46   : > { %v589_v4 = vmul.f32 32.0, %v1117_v3  ;;  %vm593_vm1 = vweird.f32 %v1117_v3  ;;  %676 = vmatpush.msra.mxu1 %v653_v24  ;;  %v1108_v42 = vld [vmem:[%s1664_s4] ss:$0 sm:$0xff]  ;;  %v849_v24 = vld [vmem:[%s1673_s13 + $0x8] sm:$0xff] }
  0x47   : > { %704 = vmatpush.msra.mxu3 %v681_v25  ;;  %v1110_v47 = vld [vmem:[%s1668_s8] ss:$0 sm:$0xff]  ;;  %807 = vmatpush.msrb.mxu0 %v787_v58 }
  0x48   : > { %v590_v5 = vsub.f32 1.0, %v589_v4  ;;  %871 = vmatpush.msrb.mxu1 %v851_v23  ;;  %v848_v25 = vld [vmem:[%s1673_s13] sm:$0xff]  ;;  %s941_s16 = scalar_lea.hbm %s1709_s19, %s1045_s26  ;;  %s1208_s23 = scalar_lea.hbm %s1709_s19, 16 }
  0x49   : > { %808 = vmatpush.msrb.mxu0 %v786_v59 }
  0x4a   : > { %v591_v6 = vmul.f32 %v1117_v3, %v590_v5 }
  0x4b   : > { %809 = vmatpush.msrb.mxu0 %v785_v60 }
  0x4c   : > { %v592_v7 = vadd.f32 %v1117_v3, %v591_v6 }
  0x4e   : > { %v1463_v8 = vsel %vm593_vm1, %v1117_v3, %v592_v7 }
  0xb3   : > { %v587_v9 = vpop.xlane.xlu0 %586 }
  0xb4   : > { %v595_v10 = vmul.f32 %v1463_v8, %v587_v9 }
  0xb6   : > { %v596_v11 = vsub.f32 %v1459_v0, %v595_v10 }
  0xb8   : > { %v597_v12 = vmul.f32 %v596_v11, %v596_v11 }
  0xba   : > { %v598_v13 = vsel %vm584_vm0, %v597_v12, 0.0 }
  0xbb   : > { %599 = vadd.xlane.f32.xlu0 %v598_v13  ;;  %v1111_v13 = vld [vmem:[%s1670_s10] ss:$0 sm:$0xff] }
 0x12e   : > { %v600_v26 = vpop.xlane.xlu0 %599 }
 0x12f   : > { %v601_v27 = vmul.f32 %v600_v26, %v1463_v8  ;;  %v903_v26 = vld [vmem:[%s1675_s15 + $0x78] sm:$0xff] }
 0x130   : > { %908 = vmatpush.msra.mxu2 %v903_v26 }
 0x131   : > { %v602_v28 = vadd.f32 1e-05, %v601_v27  ;;  %v902_v27 = vld [vmem:[%s1675_s15 + $0x70] sm:$0xff] }
 0x132   : > { %909 = vmatpush.msra.mxu2 %v902_v27 }
 0x133   : > { %1118 = vrsqrt.f32 %v602_v28  ;;  %vm609_vm3 = vweird.f32 %v602_v28 }
 0x139   : > { %v1119_v29 = vpop.eup %1118 }
 0x13a   : > { %v604_v30 = vmul.f32 %v1119_v29, %v602_v28  ;;  %vm610_vm2 = vweird.f32 %v1119_v29  ;;  %v901_v28 = vld [vmem:[%s1675_s15 + $0x68] sm:$0xff] }
 0x13b   : > { %vm611_vm4 = vmor %vm609_vm3, %vm610_vm2  ;;  %910 = vmatpush.msra.mxu2 %v901_v28 }
 0x13c   : > { %v605_v31 = vmul.f32 %v1119_v29, %v604_v30 }
 0x13e   : > { %v606_v32 = vmul.f32 0.5, %v605_v31  ;;  %v900_v31 = vld [vmem:[%s1675_s15 + $0x60] sm:$0xff] }
 0x13f   : > { %911 = vmatpush.msra.mxu2 %v900_v31 }
 0x140   : > { %v607_v33 = vsub.f32 1.5, %v606_v32 }
 0x142   : > { %v608_v34 = vmul.f32 %v1119_v29, %v607_v33 }
 0x144   : > { %v612_v36 = vsel %vm611_vm4, %v1119_v29, %v608_v34 }
 0x145   : > { %v613_v37 = vmul.f32 %v612_v36, %v596_v11  ;;  %v784_v11 = vld [vmem:[%s1669_s9] sm:$0xff] }
 0x146   : > { %810 = vmatpush.msrb.mxu0 %v784_v11 }
 0x147   : > { %v617_v39 = vmul.f32 %v1106_v35, %v613_v37 }
 0x149   : > { %v621_v40 = vadd.f32 %v1107_v38, %v617_v39 }
 0x14b   : > { %1036 = vmatmul.msk.f32.vlgmr.msra.gmra.mxu0 %vm584_vm0, %v621_v40  ;;  %1037 = vmatmul.msk.f32.vlgmr.msra.gmra.mxu1 %vm584_vm0, %v621_v40 }
 0x14c   : > { %1038 = vmatmul.msk.f32.vlgmr.msra.gmra.mxu3 %vm584_vm0, %v621_v40 }
 0x1c8   : > { %v678_v43 = vpop.f32.mrf.mxu1  ;;  %v650_v44 = vpop.f32.mrf.mxu0 }
 0x1c9   : > { %v679_v45 = vadd.f32 %v1109_v41, %v678_v43  ;;  %v651_v46 = vadd.f32 %v1108_v42, %v650_v44  ;;  %v1113_v41 = vld [vmem:[%s1706_s29] ss:$0 sm:$0xff]  ;;  %v899_v44 = vld [vmem:[%s1675_s15 + $0x58] sm:$0xff]  ;;  %s945_s29 = sshll.u32 %s941_s16, 4  ;;  %s946_s29 = int_to_ptr.hbm [resolvable:$true] %s945_s29 }
 0x1ca   : > { %912 = vmatpush.msra.mxu2 %v899_v44 }
 0x1cb   : > { %1039 = vmatpush.xpose.msk.msrb.mxu3 %vm584_vm0, %v679_v45  ;;  %v898_v45 = vld [vmem:[%s1675_s15 + $0x50] sm:$0xff] }
 0x1cc   : > { %913 = vmatpush.msra.mxu2 %v898_v45 }
 0x1ce   : > { %1040 = vmatmul.msk.f32.vlgmr.msrb.gmra.mxu3 %vm584_vm0, %v651_v46  ;;  %v897_v46 = vld [vmem:[%s1675_s15 + $0x48] sm:$0xff] }
 0x1cf   : > { %v706_v48 = vpop.f32.mrf.mxu3  ;;  %914 = vmatpush.msra.mxu2 %v897_v46 }
 0x1d0   : > { %v707_v49 = vadd.f32 %v1110_v47, %v706_v48  ;;  %v896_v47 = vld [vmem:[%s1675_s15 + $0x40] sm:$0xff]  ;;  %v895_v48 = vld [vmem:[%s1675_s15 + $0x38] sm:$0xff] }
 0x1d1   : > { %915 = vmatpush.msra.mxu2 %v896_v47 }
 0x1d2   : > { %779 = vmatpush.msra.mxu3 %v707_v49  ;;  %v894_v49 = vld [vmem:[%s1675_s15 + $0x30] sm:$0xff] }
 0x1d3   : > { %916 = vmatpush.msra.mxu2 %v895_v48 }
 0x1d5   : > { %917 = vmatpush.msra.mxu2 %v894_v49 }
 0x251   : > { %v732_v50 = vpop.f32.mrf.mxu3 }
 0x252   : > { %v735_v51 = vmul.f32 0.17677669, %v732_v50  ;;  %v893_v50 = vld [vmem:[%s1675_s15 + $0x28] sm:$0xff] }
 0x253   : > { %918 = vmatpush.msra.mxu2 %v893_v50 }
 0x254   : > { %v737_v52 = vsel %vm736_vm5, %v735_v51, -inf }
 0x255   : > { %738 = vmax.xlane.f32.xlu1 %v737_v52  ;;  %v891_v52 = vld [vmem:[%s1675_s15 + $0x18] sm:$0xff] }
 0x2c8   : > { %v739_v53 = vpop.xlane.xlu1 %738 }
 0x2c9   : > { %v740_v54 = vsub.f32 %v735_v51, %v739_v53  ;;  %v892_v51 = vld [vmem:[%s1675_s15 + $0x20] sm:$0xff]  ;;  %v890_v53 = vld [vmem:[%s1675_s15 + $0x10] sm:$0xff] }
 0x2ca   : > { %919 = vmatpush.msra.mxu2 %v892_v51 }
 0x2cb   : > { %v741_v55 = vmul.f32 1.442695, %v740_v54  ;;  %v889_v54 = vld [vmem:[%s1675_s15 + $0x8] sm:$0xff] }
 0x2cc   : > { %920 = vmatpush.msra.mxu2 %v891_v52 }
 0x2cd   : > { %1120 = vpow2.f32 %v741_v55  ;;  %v888_v55 = vld [vmem:[%s1675_s15] sm:$0xff] }
 0x2ce   : > { %921 = vmatpush.msra.mxu2 %v890_v53 }
 0x2d0   : > { %922 = vmatpush.msra.mxu2 %v889_v54 }
 0x2d2   : > { %923 = vmatpush.msra.mxu2 %v888_v55 }
 0x2d3   : > { %v1121_v56 = vpop.eup %1120 }
 0x2d4   : > { %v743_v57 = vsel %vm736_vm5, %v1121_v56, 0.0 }
 0x2d5   : > { %744 = vadd.xlane.f32.xlu1 %v743_v57 }
 0x348   : > { %v745_v61 = vpop.xlane.xlu1 %744 }
 0x349   : > { %1122 = vrcp.f32 %v745_v61  ;;  %v757_v2 = vand.u32 2147483648, %v745_v61  ;;  %v755_v4 = vand.u32 2147483647, %v745_v61  ;;  %vm751_vm7 = vweird.f32 %v745_v61 }
 0x34b   : > { %v758_v6 = vor.u32 1.1754944e-38, %v757_v2  ;;  %vm756_vm9 = vcmp.eq.f32.partialorder %v755_v4, 8.507059e+37 }
 0x34f   : > { %v1123_v62 = vpop.eup %1122 }
 0x350   : > { %v747_v63 = vmul.f32 %v1123_v62, %v745_v61  ;;  %vm752_vm6 = vweird.f32 %v1123_v62 }
 0x351   : > { %vm753_vm8 = vmor %vm751_vm7, %vm752_vm6 }
 0x352   : > { %v748_v1 = vsub.f32 1.0, %v747_v63 }
 0x354   : > { %v749_v3 = vmul.f32 %v1123_v62, %v748_v1 }
 0x356   : > { %v750_v5 = vadd.f32 %v1123_v62, %v749_v3 }
 0x358   : > { %v754_v7 = vsel %vm753_vm8, %v1123_v62, %v750_v5  ;;  %v1115_v5 = vld [vmem:[%s1708_s21] ss:$0 sm:$0xff] }
 0x359   : > { %v759_v9 = vsel %vm756_vm9, %v758_v6, %v754_v7 }
 0x35a   : > { %v760_v10 = vmul.f32 %v1121_v56, %v759_v9  ;;  %v1114_v56 = vld [vmem:[%s1707_s14] ss:$0 sm:$0xff]  ;;  %s1202_s14 = sshra.s32 %s946_s29, 4  ;;  %s1203_s14 = int_to_ptr.hbm [resolvable:$true] %s1202_s14 }
 0x35b   : > { %s1204_s0 = scalar_lea.hbm %s1203_s14, 8  ;;  %p1209_p9 = scmp.lt.s32.totalorder %s1203_s14, %s1709_s19 }
 0x35c   : > { %1041 = vmatmul.msk.f32.vlgmr.msra.gmra.mxu3 %vm736_vm5, %v760_v10  ;;  %p1205_p1 = scmp.ne.s32.totalorder %s1203_s14, %s1204_s0  ;;  %p1210_p10 = scmp.lt.s32.totalorder %s1208_s23, %s1204_s0 }
 0x35e   : > { %p1206_p4 = pnand %p1205_p1, %p1418_p3  ;;  %p1211_p2 = por %p1210_p10, %p1209_p9 }
 0x360   : > { %p1207_p8 = pneg %p1206_p4 }
 0x362   : > { %p1212_p11 = pnand %p1211_p2, %p1207_p8 }
 0x3df   : > { %v781_v12 = vpop.f32.mrf.mxu3 }
 0x3e0   : > { %1042 = vmatmul.msk.f32.vlgmr.msrb.gmra.mxu0 %vm584_vm0, %v781_v12 }
 0x45d   : > { %v812_v14 = vpop.f32.mrf.mxu0 }
 0x45e   : > { %v813_v15 = vadd.f32 %v1111_v13, %v812_v14 }
 0x460   : > { %v1542_v16 = vadd.f32 %v813_v15, %v1459_v0  ;;  %v850_v0 = vld [vmem:[%s1673_s13 + $0x10] sm:$0xff] }
 0x461   : > { %872 = vmatpush.msrb.mxu1 %v850_v0 }
 0x462   : > { %v818_v17 = vsel %vm584_vm0, %v1542_v16, 0.0 }
 0x463   : > { %819 = vadd.xlane.f32.xlu2 %v818_v17  ;;  %873 = vmatpush.msrb.mxu1 %v849_v24 }
 0x465   : > { %874 = vmatpush.msrb.mxu1 %v848_v25 }
 0x4d6   : > { %v820_v18 = vpop.xlane.xlu2 %819 }
 0x4d7   : > { %v821_v19 = vmul.f32 %v820_v18, %v1463_v8 }
 0x4d9   : > { %v822_v20 = vsub.f32 %v1542_v16, %v821_v19 }
 0x4db   : > { %v823_v21 = vmul.f32 %v822_v20, %v822_v20 }
 0x4dd   : > { %v824_v22 = vsel %vm584_vm0, %v823_v21, 0.0 }
 0x4de   : > { %825 = vadd.xlane.f32.xlu2 %v824_v22 }
 0x551   : > { %v826_v29 = vpop.xlane.xlu2 %825 }
 0x552   : > { %v827_v30 = vmul.f32 %v826_v29, %v1463_v8  ;;  %v1112_v8 = vld [vmem:[%s1671_s11] ss:$0 sm:$0xff] }
 0x554   : > { %v828_v32 = vadd.f32 1e-05, %v827_v30 }
 0x556   : > { %1124 = vrsqrt.f32 %v828_v32  ;;  %vm835_vm11 = vweird.f32 %v828_v32 }
 0x55c   : > { %v1125_v33 = vpop.eup %1124 }
 0x55d   : > { %v830_v34 = vmul.f32 %v1125_v33, %v828_v32  ;;  %vm836_vm10 = vweird.f32 %v1125_v33 }
 0x55e   : > { %vm837_vm12 = vmor %vm835_vm11, %vm836_vm10 }
 0x55f   : > { %v831_v35 = vmul.f32 %v1125_v33, %v830_v34 }
 0x561   : > { %v832_v36 = vmul.f32 0.5, %v831_v35 }
 0x563   : > { %v833_v37 = vsub.f32 1.5, %v832_v36 }
 0x565   : > { %v834_v38 = vmul.f32 %v1125_v33, %v833_v37 }
 0x567   : > { %v838_v39 = vsel %vm837_vm12, %v1125_v33, %v834_v38 }
 0x568   : > { %v839_v40 = vmul.f32 %v838_v39, %v822_v20 }
 0x56a   : > { %v843_v42 = vmul.f32 %v1112_v8, %v839_v40 }
 0x56c   : > { %v847_v43 = vadd.f32 %v1113_v41, %v843_v42 }
 0x56e   : > { %1043 = vmatmul.msk.f32.vlgmr.msrb.gmra.mxu1 %vm584_vm0, %v847_v43 }
 0x5eb   : > { %v876_v57 = vpop.f32.mrf.mxu1 }
 0x5ec   : > { %v877_v58 = vadd.f32 %v1114_v56, %v876_v57 }
 0x5ee   : > { %v880_v59 = vmul.f32 0.044715, %v877_v58  ;;  %v879_v2 = vmul.f32 0.5, %v877_v58 }
 0x5f0   : > { %v881_v60 = vmul.f32 %v880_v59, %v877_v58 }
 0x5f2   : > { %v882_v61 = vmul.f32 %v881_v60, %v877_v58 }
 0x5f4   : > { %v883_v62 = vadd.f32 %v882_v61, %v877_v58 }
 0x5f6   : > { %v884_v63 = vmul.f32 0.7978846, %v883_v62 }
 0x5f8   : > { %1126 = vtanh.f32 %v884_v63 }
 0x5fe   : > { %v1127_v1 = vpop.eup %1126 }
 0x5ff   : > { %v886_v3 = vadd.f32 1.0, %v1127_v1 }
 0x601   : > { %v887_v4 = vmul.f32 %v886_v3, %v879_v2 }
 0x603   : > { %924 = vmatmul.f32.vlgmr.msra.gmra.mxu2 %v887_v4 }
 0x686   : > { %v925_v6 = vpop.f32.mrf.mxu2 }
 0x687   : > { %v926_v7 = vadd.f32 %v1115_v5, %v925_v6 }
 0x689   : > { %v928_v9 = vadd.f32 %v926_v7, %v1542_v16 }
 0x68b   : > { %929 = vst.msk [vmem:[%s580_s17] sm:$0xff] %vm584_vm0, %v928_v9 }
 0x68c   : > { %1215 = shalt.err (!%p1212_p11)
}
 0x68d   : > { %1054 = dma.vmem_to_hbm [thread:$0]  (%p1418_p3), %s944_s24, 128, %s946_s29, %s931_s28  }
 0x68e PF: > { %s1711_s22 = sld [smem:[#allocation11_spill]]  ;;  %p1713_p12 = scmp.ge.s32.totalorder %s1258_s27, 2 }
 0x690   : > { %p1065_p13 = pnand %p1713_p12, %p1387_p6 }
 0x692   : > { %p1066_p0 = pneg %p1065_p13 }
 0x694   : > { %s957_s16 = sand.u32 1, %s1711_s22  }
 0x695   : > { %s958_s17 = scalar_lea.sflag [#allocation4], %s957_s16 }
 0x696   : > { %1241 = dma.done.wait (%p1066_p0), %s958_s17, 128  }
 0x697   : > { %1243 = vsyncadd (%p1066_p0), %s958_s17, 4294967168  ;;  %s1714_s27 = sld [smem:[#allocation14_spill]]  ;;  %s1717_s24 = smov %s1250_s25 }
 0x698   : > { %s1715_s14 = sld [smem:[#allocation12_spill]] }
 0x699   : > { %s1716_s26 = sld [smem:[#allocation15_spill]] }
 0x69d   : > { %p31_p5 = scmp.ge.s32.totalorder %s1714_s27, 4  }
 0x69e   : > { %s1718_s25 = smov %s1715_s14 }
 0x69f   :  { %33 = sbr.rel (!%p31_p5) target bundleno = 13 (0xd), region = 137 }
 0x6a4   :  { %964 = vsyncpa [#allocation3], 1 }
 0x6a5   :  { %966 = vsyncpa [#allocation3 + $0x1], 1 }
 0x6a6   :  { %967 = vsyncpa [#allocation6], 1 }
 0x6a7   :  { %968 = vsyncpa [#allocation4], 1 }
 0x6a8   :  { %970 = vsyncpa [#allocation4 + $0x1], 1 }

</bundles_post_ra>
